<compile_context>
chip_gen: v7x
topology: tpu7x:2x2x1
jax: 0.10.0
libtpu: 0.0.40
codegen_flags: <defaults>
</compile_context>

<pallas_src>
import jax
import jax.numpy as jnp
from jax import lax
from jax.experimental import pallas as pl
from jax.experimental.pallas import tpu as pltpu

_LANE = 512          # image tile width (multiple of 128 -> unmasked, lane-dense loads)
_MAX_ROW_TILE = 512  # image tile rows  (multiple of 8); 512*512*4B = 1 MiB per stream/buffer
_NP = 2              # max parallel grid slices (both TCs on v7x; sequential elsewhere)


def _round_up(x, m):
    return (x + m - 1) // m * m


def _choose_geometry(total):
    """Return (np_eff, steps, row_tile, rows_pad) for the image streams.

    Prefers an exact tiling (rows_pad == rows -> no jnp.pad copy in the
    wrapper); falls back to a minimally padded tiling otherwise.
    """
    rows = -(-total // _LANE)
    if total % _LANE == 0:
        # Try to tile exactly: rows == np_eff * steps * row_tile.
        for np_eff in (_NP, 1):
            if rows % np_eff:
                continue
            rps = rows // np_eff
            if rps % 8:
                continue
            row_tile = 8
            for cand in range(_MAX_ROW_TILE, 7, -8):
                if rps % cand == 0:
                    row_tile = cand
                    break
            return np_eff, rps // row_tile, row_tile, rows
    # Fallback: pad up to the tile grid (pads of x and x_recon are both zero,
    # so the padded region contributes exactly 0 to the squared-diff sum).
    np_eff = _NP if rows >= _NP * 8 else 1
    rps = -(-rows // np_eff)
    row_tile = min(_MAX_ROW_TILE, _round_up(rps, 8))
    steps = -(-rps // row_tile)
    return np_eff, steps, row_tile, np_eff * steps * row_tile


def _dsc_loss_kernel(scal_ref,                           # SMEM [4]: 1/N, w_coef/N, 0.5*w_selfExp/N, pad
                     xi_ref, xj_ref, xir_ref, xjr_ref,   # image row-tiles [row_tile, _LANE]
                     zi_ref, zj_ref, zir_ref, zjr_ref,   # latents [B, D] (full blocks)
                     c1_ref, c2_ref,                     # self-expression [B, B] (full blocks)
                     out_ref):                           # [1, 8, 128] f32 partial accumulator
    p = pl.program_id(0)   # parallel slice
    s = pl.program_id(1)   # reduction step over image row-tiles
    w_ae = scal_ref[0]        # 1 / N
    w_coef = scal_ref[1]      # weight_coef / N
    w_selfexp = scal_ref[2]   # 0.5 * weight_selfExp / N

    f32 = jnp.float32

    def sse(a_ref, b_ref):
        # Upcast in-register; accumulate in f32 (bf16-safe).
        d = a_ref[...].astype(f32) - b_ref[...].astype(f32)
        return jnp.sum(d * d)

    @pl.when(s == 0)
    def _init():
        out_ref[...] = jnp.zeros_like(out_ref)

    # Small once-only terms: latent self-expression SSE + coefficient penalty.
    # Only the first slice's first step computes them (constant index_maps mean
    # these inputs are DMA'd once, not per step).
    @pl.when((p == 0) & (s == 0))
    def _small():
        def coef_term(c_ref):
            c = c_ref[...].astype(f32)
            sq = c * c
            rows = lax.broadcasted_iota(jnp.int32, sq.shape, 0)
            cols = lax.broadcasted_iota(jnp.int32, sq.shape, 1)
            # ||C||_F^2 + sum(diag(C)^2) fused into a single reduce.
            w = jnp.where(rows == cols, f32(2.0), f32(1.0))
            return jnp.sum(sq * w)

        small = (w_coef * (coef_term(c1_ref) + coef_term(c2_ref))
                 + w_selfexp * (sse(zir_ref, zi_ref) + sse(zjr_ref, zj_ref)))
        out_ref[...] += small

    # Streaming autoencoder reconstruction term for this image tile
    # (1/N pre-folded into w_ae).
    partial = sse(xir_ref, xi_ref) + sse(xjr_ref, xj_ref)
    out_ref[...] += w_ae * partial


def dsc_loss(xi, xj, xi_recon, xj_recon,
             zi, zj, zi_recon, zj_recon,
             self_expression1, self_expression2,
             weight_coef, weight_selfExp, num_samples):
    f32 = jnp.float32

    # --- static tiling geometry for the image streams (shape-only) ---
    total = max(xi.size, xj.size)
    np_eff, steps, row_tile, rows_pad = _choose_geometry(total)

    def prep_image(x):
        # Flatten; zero-pad only if the exact tiling was not possible (pads are
        # identical for x and x_recon -> zero diff). Native dtype is kept.
        flat = x.reshape(-1)
        pad = rows_pad * _LANE - flat.shape[0]
        if pad:
            flat = jnp.pad(flat, (0, pad))
        return flat.reshape(rows_pad, _LANE)

    xi2, xj2 = prep_image(xi), prep_image(xj)
    xir2, xjr2 = prep_image(xi_recon), prep_image(xj_recon)

    # Pre-fold 1/N and 0.5*weight_selfExp into the scalar weights.
    inv_n = jnp.asarray(1.0, f32) / jnp.asarray(num_samples, f32)
    scalars = jnp.stack([
        jnp.asarray(1.0, f32),
        jnp.asarray(weight_coef, f32),
        jnp.asarray(weight_selfExp, f32) * 0.5,
        jnp.asarray(0.0, f32),
    ]) * inv_n

    img_spec = pl.BlockSpec((row_tile, _LANE), lambda p, s: (p * steps + s, 0))

    def whole(a):  # full-array VMEM block, fetched once (constant index_map)
        return pl.BlockSpec(a.shape, lambda p, s: (0, 0))

    out = pl.pallas_call(
        _dsc_loss_kernel,
        out_shape=jax.ShapeDtypeStruct((np_eff, 8, 128), f32),
        grid=(np_eff, steps),
        in_specs=[pl.BlockSpec(memory_space=pltpu.SMEM),
                  img_spec, img_spec, img_spec, img_spec,
                  whole(zi), whole(zj), whole(zi_recon), whole(zj_recon),
                  whole(self_expression1), whole(self_expression2)],
        out_specs=pl.BlockSpec((1, 8, 128), lambda p, s: (p, 0, 0)),
        compiler_params=pltpu.CompilerParams(
            dimension_semantics=("parallel", "arbitrary")),
    )(scalars, xi2, xj2, xir2, xjr2,
      zi, zj, zi_recon, zj_recon, self_expression1, self_expression2)

    # Each parallel slice wrote its partial (broadcast across its 8x128 tile).
    return jnp.sum(out[:, 0, 0])


def _reference_loss(xi, xj, xi_recon, xj_recon,
                    zi, zj, zi_recon, zj_recon,
                    c1, c2, weight_coef, weight_selfExp, num_samples):
    # Pure-JAX reference mirroring the PyTorch module exactly.
    def sse(a, b):
        return jnp.sum((a - b) ** 2)
    loss_ae = sse(xi_recon, xi) + sse(xj_recon, xj)
    loss_coef = (jnp.sum(c1 ** 2) + jnp.sum(jnp.diagonal(c1) ** 2)
                 + jnp.sum(c2 ** 2) + jnp.sum(jnp.diagonal(c2) ** 2))
    loss_selfexp = sse(zi_recon, zi) + sse(zj_recon, zj)
    loss = loss_ae + weight_coef * loss_coef + weight_selfExp * 0.5 * loss_selfexp
    return loss / num_samples


if __name__ == "__main__":
    key = jax.random.PRNGKey(0)
    B, C, H, W, D = 2, 4, 16, 16, 32
    ks = jax.random.split(key, 10)
    xi = jax.random.normal(ks[0], (B, C, H, W), jnp.float32)
    xj = jax.random.normal(ks[1], (B, C, H, W), jnp.float32)
    xi_recon = jax.random.normal(ks[2], (B, C, H, W), jnp.float32)
    xj_recon = jax.random.normal(ks[3], (B, C, H, W), jnp.float32)
    zi = jax.random.normal(ks[4], (B, D), jnp.float32)
    zj = jax.random.normal(ks[5], (B, D), jnp.float32)
    zi_recon = jax.random.normal(ks[6], (B, D), jnp.float32)
    zj_recon = jax.random.normal(ks[7], (B, D), jnp.float32)
    c1 = jax.random.normal(ks[8], (B, B), jnp.float32)
    c2 = jax.random.normal(ks[9], (B, B), jnp.float32)

    weight_coef = 1.0
    weight_selfExp = 0.5
    num_samples = 1000

    dsc_loss_jit = jax.jit(dsc_loss)
    loss = dsc_loss_jit(xi, xj, xi_recon, xj_recon,
                        zi, zj, zi_recon, zj_recon,
                        c1, c2, weight_coef, weight_selfExp, num_samples)
    loss = jax.block_until_ready(loss)

    ref = _reference_loss(xi, xj, xi_recon, xj_recon,
                          zi, zj, zi_recon, zj_recon,
                          c1, c2, weight_coef, weight_selfExp, num_samples)
    assert jnp.allclose(loss, ref, rtol=1e-5, atol=1e-5), (loss, ref)
    print("KERNEL_OK")
</pallas_src>

<mosaic_0001>
module attributes {stable_mosaic.version = 11 : i64} {
  func.func @_dsc_loss_kernel(%arg0: i32, %arg1: i32, %arg2: memref<4xf32, #tpu.memory_space<smem>>, %arg3: memref<8x512xf32, #tpu.memory_space<vmem>>, %arg4: memref<8x512xf32, #tpu.memory_space<vmem>>, %arg5: memref<8x512xf32, #tpu.memory_space<vmem>>, %arg6: memref<8x512xf32, #tpu.memory_space<vmem>>, %arg7: memref<2x32xf32, #tpu.memory_space<vmem>>, %arg8: memref<2x32xf32, #tpu.memory_space<vmem>>, %arg9: memref<2x32xf32, #tpu.memory_space<vmem>>, %arg10: memref<2x32xf32, #tpu.memory_space<vmem>>, %arg11: memref<2x2xf32, #tpu.memory_space<vmem>>, %arg12: memref<2x2xf32, #tpu.memory_space<vmem>>, %arg13: memref<1x8x128xf32, #tpu.memory_space<vmem>>) attributes {dimension_semantics = [#tpu.dimension_semantics<parallel>, #tpu.dimension_semantics<arbitrary>], iteration_bounds = array<i64: 1, 1>, scalar_prefetch = 0 : i64, scratch_operands = 0 : i64, tpu.core_type = #tpu.core_type<tc>, window_params = [{transform_indices = @transform_0, window_bounds = array<i64: 4>}, {transform_indices = @transform_1, window_bounds = array<i64: 8, 512>}, {transform_indices = @transform_2, window_bounds = array<i64: 8, 512>}, {transform_indices = @transform_3, window_bounds = array<i64: 8, 512>}, {transform_indices = @transform_4, window_bounds = array<i64: 8, 512>}, {pipeline_mode = #tpu.pipeline_mode<synchronous>, transform_indices = @transform_5, window_bounds = array<i64: 2, 32>}, {pipeline_mode = #tpu.pipeline_mode<synchronous>, transform_indices = @transform_6, window_bounds = array<i64: 2, 32>}, {pipeline_mode = #tpu.pipeline_mode<synchronous>, transform_indices = @transform_7, window_bounds = array<i64: 2, 32>}, {pipeline_mode = #tpu.pipeline_mode<synchronous>, transform_indices = @transform_8, window_bounds = array<i64: 2, 32>}, {pipeline_mode = #tpu.pipeline_mode<synchronous>, transform_indices = @transform_9, window_bounds = array<i64: 2, 2>}, {pipeline_mode = #tpu.pipeline_mode<synchronous>, transform_indices = @transform_10, window_bounds = array<i64: 2, 2>}, {transform_indices = @transform_11, window_bounds = array<i64: 1, 8, 128>}]} {
    %c0 = arith.constant 0 : index
    %0 = memref.load %arg2[%c0] : memref<4xf32, #tpu.memory_space<smem>>
    %c1 = arith.constant 1 : index
    %1 = memref.load %arg2[%c1] : memref<4xf32, #tpu.memory_space<smem>>
    %c2 = arith.constant 2 : index
    %2 = memref.load %arg2[%c2] : memref<4xf32, #tpu.memory_space<smem>>
    %c0_i32 = arith.constant 0 : i32
    %3 = arith.cmpi eq, %arg1, %c0_i32 : i32
    %4 = arith.extui %3 : i1 to i32
    %c0_i32_0 = arith.constant 0 : i32
    %5 = arith.cmpi ne, %4, %c0_i32_0 : i32
    scf.if %5 {
      %cst_19 = arith.constant 0.000000e+00 : f32
      %33 = vector.broadcast %cst_19 : f32 to vector<1x8x128xf32>
      %c0_20 = arith.constant 0 : index
      %c0_21 = arith.constant 0 : index
      %c0_22 = arith.constant 0 : index
      %34 = vector.load %arg13[%c0_20, %c0_21, %c0_22] : memref<1x8x128xf32, #tpu.memory_space<vmem>>, vector<1x8x128xf32>
      tpu.vector_store %arg13[%c0_20, %c0_21, %c0_22], %33 {strides = array<i32>} : memref<1x8x128xf32, #tpu.memory_space<vmem>>, vector<1x8x128xf32>,
    } else {
    }
    %c0_i32_1 = arith.constant 0 : i32
    %6 = arith.cmpi eq, %arg0, %c0_i32_1 : i32
    %c0_i32_2 = arith.constant 0 : i32
    %7 = arith.cmpi eq, %arg1, %c0_i32_2 : i32
    %8 = arith.andi %6, %7 : i1
    %9 = arith.extui %8 : i1 to i32
    %c0_i32_3 = arith.constant 0 : i32
    %10 = arith.cmpi ne, %9, %c0_i32_3 : i32
    scf.if %10 {
      %c0_19 = arith.constant 0 : index
      %c0_20 = arith.constant 0 : index
      %33 = vector.load %arg11[%c0_19, %c0_20] : memref<2x2xf32, #tpu.memory_space<vmem>>, vector<2x2xf32>
      %34 = arith.mulf %33, %33 : vector<2x2xf32>
      %35 = tpu.iota {dimensions = array<i32: 0>} : vector<2x2xi32>
      %36 = tpu.iota {dimensions = array<i32: 1>} : vector<2x2xi32>
      %37 = arith.cmpi eq, %35, %36 : vector<2x2xi32>
      %cst_21 = arith.constant 2.000000e+00 : f32
      %cst_22 = arith.constant 1.000000e+00 : f32
      %38 = vector.broadcast %cst_21 : f32 to vector<2x2xf32>
      %39 = vector.broadcast %cst_22 : f32 to vector<2x2xf32>
      %40 = arith.select %37, %38, %39 : vector<2x2xi1>, vector<2x2xf32>
      %41 = arith.mulf %34, %40 : vector<2x2xf32>
      %42 = vector.shape_cast %41 : vector<2x2xf32> to vector<1x2x2xf32>
      %cst_23 = arith.constant dense<0.000000e+00> : vector<1xf32>
      %43 = vector.multi_reduction <add>, %42, %cst_23 [1, 2] : vector<1x2x2xf32> to vector<1xf32>
      %44 = vector.shape_cast %43 : vector<1xf32> to vector<1x1x1xf32>
      %45 = vector.extract %44[0, 0, 0] : f32 from vector<1x1x1xf32>
      %c0_24 = arith.constant 0 : index
      %c0_25 = arith.constant 0 : index
      %46 = vector.load %arg12[%c0_24, %c0_25] : memref<2x2xf32, #tpu.memory_space<vmem>>, vector<2x2xf32>
      %47 = arith.mulf %46, %46 : vector<2x2xf32>
      %48 = tpu.iota {dimensions = array<i32: 0>} : vector<2x2xi32>
      %49 = tpu.iota {dimensions = array<i32: 1>} : vector<2x2xi32>
      %50 = arith.cmpi eq, %48, %49 : vector<2x2xi32>
      %cst_26 = arith.constant 2.000000e+00 : f32
      %cst_27 = arith.constant 1.000000e+00 : f32
      %51 = vector.broadcast %cst_26 : f32 to vector<2x2xf32>
      %52 = vector.broadcast %cst_27 : f32 to vector<2x2xf32>
      %53 = arith.select %50, %51, %52 : vector<2x2xi1>, vector<2x2xf32>
      %54 = arith.mulf %47, %53 : vector<2x2xf32>
      %55 = vector.shape_cast %54 : vector<2x2xf32> to vector<1x2x2xf32>
      %cst_28 = arith.constant dense<0.000000e+00> : vector<1xf32>
      %56 = vector.multi_reduction <add>, %55, %cst_28 [1, 2] : vector<1x2x2xf32> to vector<1xf32>
      %57 = vector.shape_cast %56 : vector<1xf32> to vector<1x1x1xf32>
      %58 = vector.extract %57[0, 0, 0] : f32 from vector<1x1x1xf32>
      %59 = arith.addf %45, %58 : f32
      %60 = arith.mulf %1, %59 : f32
      %c0_29 = arith.constant 0 : index
      %c0_30 = arith.constant 0 : index
      %61 = vector.load %arg9[%c0_29, %c0_30] : memref<2x32xf32, #tpu.memory_space<vmem>>, vector<2x32xf32>
      %c0_31 = arith.constant 0 : index
      %c0_32 = arith.constant 0 : index
      %62 = vector.load %arg7[%c0_31, %c0_32] : memref<2x32xf32, #tpu.memory_space<vmem>>, vector<2x32xf32>
      %63 = arith.subf %61, %62 : vector<2x32xf32>
      %64 = arith.mulf %63, %63 : vector<2x32xf32>
      %65 = vector.shape_cast %64 : vector<2x32xf32> to vector<1x2x32xf32>
      %cst_33 = arith.constant dense<0.000000e+00> : vector<1xf32>
      %66 = vector.multi_reduction <add>, %65, %cst_33 [1, 2] : vector<1x2x32xf32> to vector<1xf32>
      %67 = vector.shape_cast %66 : vector<1xf32> to vector<1x1x1xf32>
      %68 = vector.extract %67[0, 0, 0] : f32 from vector<1x1x1xf32>
      %c0_34 = arith.constant 0 : index
      %c0_35 = arith.constant 0 : index
      %69 = vector.load %arg10[%c0_34, %c0_35] : memref<2x32xf32, #tpu.memory_space<vmem>>, vector<2x32xf32>
      %c0_36 = arith.constant 0 : index
      %c0_37 = arith.constant 0 : index
      %70 = vector.load %arg8[%c0_36, %c0_37] : memref<2x32xf32, #tpu.memory_space<vmem>>, vector<2x32xf32>
      %71 = arith.subf %69, %70 : vector<2x32xf32>
      %72 = arith.mulf %71, %71 : vector<2x32xf32>
      %73 = vector.shape_cast %72 : vector<2x32xf32> to vector<1x2x32xf32>
      %cst_38 = arith.constant dense<0.000000e+00> : vector<1xf32>
      %74 = vector.multi_reduction <add>, %73, %cst_38 [1, 2] : vector<1x2x32xf32> to vector<1xf32>
      %75 = vector.shape_cast %74 : vector<1xf32> to vector<1x1x1xf32>
      %76 = vector.extract %75[0, 0, 0] : f32 from vector<1x1x1xf32>
      %77 = arith.addf %68, %76 : f32
      %78 = arith.mulf %2, %77 : f32
      %79 = arith.addf %60, %78 : f32
      %c0_39 = arith.constant 0 : index
      %c0_40 = arith.constant 0 : index
      %c0_41 = arith.constant 0 : index
      %80 = vector.load %arg13[%c0_39, %c0_40, %c0_41] : memref<1x8x128xf32, #tpu.memory_space<vmem>>, vector<1x8x128xf32>
      %81 = vector.broadcast %79 : f32 to vector<1x8x128xf32>
      %82 = arith.addf %80, %81 : vector<1x8x128xf32>
      %c0_42 = arith.constant 0 : index
      %c0_43 = arith.constant 0 : index
      %c0_44 = arith.constant 0 : index
      %83 = vector.load %arg13[%c0_42, %c0_43, %c0_44] : memref<1x8x128xf32, #tpu.memory_space<vmem>>, vector<1x8x128xf32>
      tpu.vector_store %arg13[%c0_42, %c0_43, %c0_44], %82 {strides = array<i32>} : memref<1x8x128xf32, #tpu.memory_space<vmem>>, vector<1x8x128xf32>,
    } else {
    }
    %c0_4 = arith.constant 0 : index
    %c0_5 = arith.constant 0 : index
    %11 = vector.load %arg5[%c0_4, %c0_5] : memref<8x512xf32, #tpu.memory_space<vmem>>, vector<8x512xf32>
    %c0_6 = arith.constant 0 : index
    %c0_7 = arith.constant 0 : index
    %12 = vector.load %arg3[%c0_6, %c0_7] : memref<8x512xf32, #tpu.memory_space<vmem>>, vector<8x512xf32>
    %13 = arith.subf %11, %12 : vector<8x512xf32>
    %14 = arith.mulf %13, %13 : vector<8x512xf32>
    %15 = vector.shape_cast %14 : vector<8x512xf32> to vector<1x8x512xf32>
    %cst = arith.constant dense<0.000000e+00> : vector<1xf32>
    %16 = vector.multi_reduction <add>, %15, %cst [1, 2] : vector<1x8x512xf32> to vector<1xf32>
    %17 = vector.shape_cast %16 : vector<1xf32> to vector<1x1x1xf32>
    %18 = vector.extract %17[0, 0, 0] : f32 from vector<1x1x1xf32>
    %c0_8 = arith.constant 0 : index
    %c0_9 = arith.constant 0 : index
    %19 = vector.load %arg6[%c0_8, %c0_9] : memref<8x512xf32, #tpu.memory_space<vmem>>, vector<8x512xf32>
    %c0_10 = arith.constant 0 : index
    %c0_11 = arith.constant 0 : index
    %20 = vector.load %arg4[%c0_10, %c0_11] : memref<8x512xf32, #tpu.memory_space<vmem>>, vector<8x512xf32>
    %21 = arith.subf %19, %20 : vector<8x512xf32>
    %22 = arith.mulf %21, %21 : vector<8x512xf32>
    %23 = vector.shape_cast %22 : vector<8x512xf32> to vector<1x8x512xf32>
    %cst_12 = arith.constant dense<0.000000e+00> : vector<1xf32>
    %24 = vector.multi_reduction <add>, %23, %cst_12 [1, 2] : vector<1x8x512xf32> to vector<1xf32>
    %25 = vector.shape_cast %24 : vector<1xf32> to vector<1x1x1xf32>
    %26 = vector.extract %25[0, 0, 0] : f32 from vector<1x1x1xf32>
    %27 = arith.addf %18, %26 : f32
    %c0_13 = arith.constant 0 : index
    %c0_14 = arith.constant 0 : index
    %c0_15 = arith.constant 0 : index
    %28 = vector.load %arg13[%c0_13, %c0_14, %c0_15] : memref<1x8x128xf32, #tpu.memory_space<vmem>>, vector<1x8x128xf32>
    %29 = arith.mulf %0, %27 : f32
    %30 = vector.broadcast %29 : f32 to vector<1x8x128xf32>
    %31 = arith.addf %28, %30 : vector<1x8x128xf32>
    %c0_16 = arith.constant 0 : index
    %c0_17 = arith.constant 0 : index
    %c0_18 = arith.constant 0 : index
    %32 = vector.load %arg13[%c0_16, %c0_17, %c0_18] : memref<1x8x128xf32, #tpu.memory_space<vmem>>, vector<1x8x128xf32>
    tpu.vector_store %arg13[%c0_16, %c0_17, %c0_18], %31 {strides = array<i32>} : memref<1x8x128xf32, #tpu.memory_space<vmem>>, vector<1x8x128xf32>,
    return
  }
  func.func @transform_0(%arg0: i32, %arg1: i32) -> i32 {
    %c0_i32 = arith.constant 0 : i32
    %c0_i32_0 = arith.constant 0 : i32
    return %c0_i32 : i32
  }
  func.func @transform_1(%arg0: i32, %arg1: i32) -> (i32, i32) {
    %c1_i32 = arith.constant 1 : i32
    %0 = arith.muli %arg0, %c1_i32 : i32
    %1 = arith.addi %0, %arg1 : i32
    %c0_i32 = arith.constant 0 : i32
    %c0_i32_0 = arith.constant 0 : i32
    return %1, %c0_i32 : i32, i32
  }
  func.func @transform_2(%arg0: i32, %arg1: i32) -> (i32, i32) {
    %c1_i32 = arith.constant 1 : i32
    %0 = arith.muli %arg0, %c1_i32 : i32
    %1 = arith.addi %0, %arg1 : i32
    %c0_i32 = arith.constant 0 : i32
    %c0_i32_0 = arith.constant 0 : i32
    return %1, %c0_i32 : i32, i32
  }
  func.func @transform_3(%arg0: i32, %arg1: i32) -> (i32, i32) {
    %c1_i32 = arith.constant 1 : i32
    %0 = arith.muli %arg0, %c1_i32 : i32
    %1 = arith.addi %0, %arg1 : i32
    %c0_i32 = arith.constant 0 : i32
    %c0_i32_0 = arith.constant 0 : i32
    return %1, %c0_i32 : i32, i32
  }
  func.func @transform_4(%arg0: i32, %arg1: i32) -> (i32, i32) {
    %c1_i32 = arith.constant 1 : i32
    %0 = arith.muli %arg0, %c1_i32 : i32
    %1 = arith.addi %0, %arg1 : i32
    %c0_i32 = arith.constant 0 : i32
    %c0_i32_0 = arith.constant 0 : i32
    return %1, %c0_i32 : i32, i32
  }
  func.func @transform_5(%arg0: i32, %arg1: i32) -> (i32, i32) {
    %c0_i32 = arith.constant 0 : i32
    %c0_i32_0 = arith.constant 0 : i32
    %c0_i32_1 = arith.constant 0 : i32
    return %c0_i32, %c0_i32_0 : i32, i32
  }
  func.func @transform_6(%arg0: i32, %arg1: i32) -> (i32, i32) {
    %c0_i32 = arith.constant 0 : i32
    %c0_i32_0 = arith.constant 0 : i32
    %c0_i32_1 = arith.constant 0 : i32
    return %c0_i32, %c0_i32_0 : i32, i32
  }
  func.func @transform_7(%arg0: i32, %arg1: i32) -> (i32, i32) {
    %c0_i32 = arith.constant 0 : i32
    %c0_i32_0 = arith.constant 0 : i32
    %c0_i32_1 = arith.constant 0 : i32
    return %c0_i32, %c0_i32_0 : i32, i32
  }
  func.func @transform_8(%arg0: i32, %arg1: i32) -> (i32, i32) {
    %c0_i32 = arith.constant 0 : i32
    %c0_i32_0 = arith.constant 0 : i32
    %c0_i32_1 = arith.constant 0 : i32
    return %c0_i32, %c0_i32_0 : i32, i32
  }
  func.func @transform_9(%arg0: i32, %arg1: i32) -> (i32, i32) {
    %c0_i32 = arith.constant 0 : i32
    %c0_i32_0 = arith.constant 0 : i32
    %c0_i32_1 = arith.constant 0 : i32
    return %c0_i32, %c0_i32_0 : i32, i32
  }
  func.func @transform_10(%arg0: i32, %arg1: i32) -> (i32, i32) {
    %c0_i32 = arith.constant 0 : i32
    %c0_i32_0 = arith.constant 0 : i32
    %c0_i32_1 = arith.constant 0 : i32
    return %c0_i32, %c0_i32_0 : i32, i32
  }
  func.func @transform_11(%arg0: i32, %arg1: i32) -> (i32, i32, i32) {
    %c0_i32 = arith.constant 0 : i32
    %c0_i32_0 = arith.constant 0 : i32
    %c0_i32_1 = arith.constant 0 : i32
    return %arg0, %c0_i32, %c0_i32_0 : i32, i32, i32
  }
}

</mosaic_0001>

<bundles_post_ra>
// kernel: dsc_loss.1
= control target key start
LH: loop header
LB: loop body
LE: loop exit
PB: predicated region body
PF: predicated region fallthrough
CT: control target
= control target key end

     0   :  { %16 = vsyncpa [#allocation3], 0  ;;  %s475_s0 = inlined_call_operand.vmem [shape: f32[4], index: 0, kind: input, shape index: {}]   ;;  %s476_s1 = inlined_call_operand.vmem [shape: f32[8,512], index: 1, kind: input, shape index: {}]   ;;  %s477_s2 = inlined_call_operand.vmem [shape: f32[8,512], index: 2, kind: input, shape index: {}]   ;;  %s478_s3 = inlined_call_operand.vmem [shape: f32[8,512], index: 3, kind: input, shape index: {}]   ;;  %s479_s4 = inlined_call_operand.vmem [shape: f32[8,512], index: 4, kind: input, shape index: {}]   ;;  %s480_s5 = inlined_call_operand.vmem [shape: f32[2,32], index: 5, kind: input, shape index: {}]   ;;  %s481_s6 = inlined_call_operand.vmem [shape: f32[2,32], index: 6, kind: input, shape index: {}]   ;;  %s482_s7 = inlined_call_operand.vmem [shape: f32[2,32], index: 7, kind: input, shape index: {}]   ;;  %s483_s8 = inlined_call_operand.vmem [shape: f32[2,32], index: 8, kind: input, shape index: {}]   ;;  %s484_s9 = inlined_call_operand.vmem [shape: f32[2,2], index: 9, kind: input, shape index: {}]   ;;  %s485_s10 = inlined_call_operand.vmem [shape: f32[2,2], index: 10, kind: input, shape index: {}]   ;;  %s486_s11 = inlined_call_operand.vmem [shape: f32[1,8,128], index: 11, kind: output, shape index: {}]  }
   0x1   :  { %s23_s19 = sshll.u32 %s475_s0, 4  ;;  %s24_s19 = int_to_ptr.vmem [resolvable:$true] %s23_s19 }
   0x2   :  { %s323_s20 = scalar_lea.vmem %s24_s19, 16  ;;  %p328_p1 = scmp.lt.s32.totalorder %s24_s19, %s24_s19 }
   0x3   :  { %p324_p0 = scmp.ne.s32.totalorder %s24_s19, %s323_s20  ;;  %p329_p2 = scmp.lt.s32.totalorder %s323_s20, %s323_s20 }
   0x5   :  { %p330_p3 = por %p329_p2, %p328_p1 }
   0x7   :  { %p331_p4 = pnand %p330_p3, %p324_p0 }
   0x9   :  { %334 = shalt.err (!%p331_p4)
}
   0xa   :  { %s337_s21 = smov [#allocation2]  }
   0xb   :  { %26 = dma.vmem_to_smem %s24_s19, 16, %s337_s21, [#allocation3]  }
   0xc   :  { %335 = dma.done.wait [#allocation3], 16  }
   0xd   :  { %336 = vsyncadd [#allocation3], 4294967280 }
   0xe   :  { %78 = sfence }
   0xf   :  { %v179_v0 = vld [vmem:[%s482_s7] sm:$0x3]  ;;  %vm183_vm0 = vcmask 254976   ;;  %v146_v2 = vlaneseq  ;;  %v244_v15 = vld [vmem:[%s479_s4 + $0x8] sm:$0xff]  ;;  %v245_v16 = vld [vmem:[%s479_s4 + $0x10] sm:$0xff]  ;;  %vm153_vm2 = vcmask 9216  }
  0x10   :  { %v180_v1 = vld [vmem:[%s480_s5] sm:$0x3]  ;;  %v246_v17 = vld [vmem:[%s479_s4 + $0x18] sm:$0xff]  ;;  %v248_v19 = vld [vmem:[%s477_s2 + $0x8] sm:$0xff]  ;;  %v338_v22 = vmov 1.0   ;;  %s131_s18 = sld [smem:[#allocation2]] }
  0x11   :  { %v181_v3 = vsub.f32 %v179_v0, %v180_v1  ;;  %v144_v4 = vld [vmem:[%s484_s9] sm:$0x3]  ;;  %v147_v8 = vshrl.u32 %v146_v2, 7  ;;  %v149_v9 = vand.u32 127, %v146_v2  ;;  %v249_v20 = vld [vmem:[%s477_s2 + $0x10] sm:$0xff]  ;;  %v250_v25 = vld [vmem:[%s477_s2 + $0x18] sm:$0xff]  ;;  %v252_v31 = vsub.f32 %v244_v15, %v248_v19 }
  0x12   :  { %v194_v5 = vld [vmem:[%s483_s8] sm:$0x3]  ;;  %v145_v7 = vmul.f32 %v144_v4, %v144_v4  ;;  %v216_v28 = vld [vmem:[%s478_s3 + $0x8] sm:$0xff]  ;;  %v253_v32 = vsub.f32 %v245_v16, %v249_v20  ;;  %v217_v33 = vld [vmem:[%s478_s3 + $0x10] sm:$0xff]  ;;  %v254_v37 = vsub.f32 %v246_v17, %v250_v25 }
  0x13   :  { %v243_v6 = vld [vmem:[%s479_s4] sm:$0xff]  ;;  %v182_v12 = vmul.f32 %v181_v3, %v181_v3  ;;  %vm150_vm1 = vcmp.eq.s32.totalorder %v147_v8, %v149_v9  ;;  %v218_v34 = vld [vmem:[%s478_s3 + $0x18] sm:$0xff]  ;;  %v220_v39 = vld [vmem:[%s476_s1 + $0x8] sm:$0xff]  ;;  %v256_v44 = vmul.f32 %v252_v31, %v252_v31 }
  0x14   :  { %v195_v10 = vld [vmem:[%s481_s6] sm:$0x3]  ;;  %v151_v23 = vsel %vm150_vm1, 2.0, %v338_v22  ;;  %v221_v40 = vld [vmem:[%s476_s1 + $0x10] sm:$0xff]  ;;  %v222_v41 = vld [vmem:[%s476_s1 + $0x18] sm:$0xff]  ;;  %v257_v45 = vmul.f32 %v253_v32, %v253_v32  ;;  %v224_v46 = vsub.f32 %v216_v28, %v220_v39  ;;  %v258_v50 = vmul.f32 %v254_v37, %v254_v37 }
  0x15   :  { %v164_v11 = vld [vmem:[%s485_s10] sm:$0x3]  ;;  %v196_v13 = vsub.f32 %v194_v5, %v195_v10  ;;  %v184_v21 = vsel %vm183_vm0, %v182_v12, 0.0  ;;  %v152_v29 = vmul.f32 %v151_v23, %v145_v7  ;;  %v225_v47 = vsub.f32 %v217_v33, %v221_v40 }
  0x16   :  { %v165_v14 = vmul.f32 %v164_v11, %v164_v11  ;;  %v247_v18 = vld [vmem:[%s477_s2] sm:$0xff]  ;;  %185 = vadd.xlane.f32.xlu1 %v184_v21  ;;  %v226_v48 = vsub.f32 %v218_v34, %v222_v41  ;;  %v228_v53 = vmul.f32 %v224_v46, %v224_v46 }
  0x17   :  { %v197_v24 = vmul.f32 %v196_v13, %v196_v13  ;;  %v251_v26 = vsub.f32 %v243_v6, %v247_v18  ;;  %v215_v27 = vld [vmem:[%s478_s3] sm:$0xff]  ;;  %v154_v43 = vsel %vm153_vm2, %v152_v29, 0.0  ;;  %v229_v54 = vmul.f32 %v225_v47, %v225_v47  ;;  %s307_s3 = sld [smem:[#allocation2 + $0x2]] }
  0x18   :  { %v166_v30 = vmul.f32 %v165_v14, %v151_v23  ;;  %v219_v35 = vld [vmem:[%s476_s1] sm:$0xff]  ;;  %155 = vadd.xlane.f32.xlu0 %v154_v43  ;;  %v230_v56 = vmul.f32 %v226_v48, %v226_v48  ;;  %s306_s1 = sld [smem:[#allocation2 + $0x1]] }
  0x19   :  { %v198_v36 = vsel %vm183_vm0, %v197_v24, 0.0  ;;  %v255_v38 = vmul.f32 %v251_v26, %v251_v26  ;;  %v223_v42 = vsub.f32 %v215_v27, %v219_v35 }
  0x1a   :  { %199 = vadd.xlane.f32.xlu1 %v198_v36  ;;  %v167_v49 = vsel %vm153_vm2, %v166_v30, 0.0 }
  0x1b   :  { %v259_v51 = vadd.f32 %v256_v44, %v255_v38  ;;  %v227_v52 = vmul.f32 %v223_v42, %v223_v42 }
  0x1c   :  { %168 = vadd.xlane.f32.xlu0 %v167_v49 }
  0x1d   :  { %v260_v55 = vadd.f32 %v259_v51, %v257_v45  ;;  %v231_v57 = vadd.f32 %v228_v53, %v227_v52 }
  0x1f   :  { %v261_v58 = vadd.f32 %v260_v55, %v258_v50  ;;  %v232_v59 = vadd.f32 %v231_v57, %v229_v54 }
  0x21   :  { %262 = vadd.xlane.f32.xlu1 %v261_v58  ;;  %v233_v60 = vadd.f32 %v232_v59, %v230_v56 }
  0x23   :  { %234 = vadd.xlane.f32.xlu0 %v233_v60 }
  0xa3   :  { %v186_v61 = vpop.xlane.xlu1 %185 }
  0xa4   :  { %v187_v62 = vrot.slane %v186_v61, 4 }
  0xa5   :  { %v156_v0 = vpop.xlane.xlu0 %155 }
  0xa6   :  { %v188_v63 = vadd.f32 %v187_v62, %v186_v61  ;;  %v157_v1 = vrot.slane %v156_v0, 4 }
  0xa7   :  { %v200_v2 = vpop.xlane.xlu1 %199 }
  0xa8   :  { %v201_v3 = vrot.slane %v200_v2, 4  ;;  %v158_v4 = vadd.f32 %v157_v1, %v156_v0  ;;  %v189_v5 = vrot.slane %v188_v63, 2 }
  0xa9   :  { %v169_v7 = vpop.xlane.xlu0 %168 }
  0xaa   :  { %v202_v6 = vadd.f32 %v201_v3, %v200_v2  ;;  %v159_v8 = vrot.slane %v158_v4, 2  ;;  %v170_v9 = vrot.slane %v169_v7, 4  ;;  %v190_v15 = vadd.f32 %v189_v5, %v188_v63 }
  0xac   :  { %v203_v10 = vrot.slane %v202_v6, 2  ;;  %v171_v11 = vadd.f32 %v170_v9, %v169_v7  ;;  %v160_v13 = vadd.f32 %v159_v8, %v158_v4  ;;  %v191_v25 = vrot.slane %v190_v15, 1 }
  0xae   :  { %v263_v12 = vpop.xlane.xlu1 %262  ;;  %v172_v16 = vrot.slane %v171_v11, 2  ;;  %v161_v17 = vrot.slane %v160_v13, 1  ;;  %v204_v18 = vadd.f32 %v203_v10, %v202_v6  ;;  %v192_v32 = vadd.f32 %v191_v25, %v190_v15 }
  0xaf   :  { %v264_v14 = vrot.slane %v263_v12, 4 }
  0xb0   :  { %v235_v20 = vpop.xlane.xlu0 %234  ;;  %v162_v22 = vadd.f32 %v161_v17, %v160_v13  ;;  %v173_v23 = vadd.f32 %v172_v16, %v171_v11  ;;  %v205_v28 = vrot.slane %v204_v18, 1 }
  0xb1   :  { %v265_v19 = vadd.f32 %v264_v14, %v263_v12  ;;  %v236_v21 = vrot.slane %v235_v20, 4 }
  0xb2   :  { %308 = vpush %v162_v22  ;;  %v174_v27 = vrot.slane %v173_v23, 1  ;;  %v206_v34 = vadd.f32 %v205_v28, %v204_v18 }
  0xb3   :  { %v266_v24 = vrot.slane %v265_v19, 2  ;;  %v237_v26 = vadd.f32 %v236_v21, %v235_v20 }
  0xb4   :  { %v175_v31 = vadd.f32 %v174_v27, %v173_v23 }
  0xb5   :  { %v267_v29 = vadd.f32 %v266_v24, %v265_v19  ;;  %v238_v30 = vrot.slane %v237_v26, 2 }
  0xb6   :  { %310 = vpush %v175_v31 }
  0xb7   :  { %v239_v33 = vadd.f32 %v238_v30, %v237_v26  ;;  %312 = vpush %v192_v32  ;;  %v268_v35 = vrot.slane %v267_v29, 1 }
  0xb8   :  { %314 = vpush %v206_v34 }
  0xb9   :  { %v240_v36 = vrot.slane %v239_v33, 1  ;;  %v269_v38 = vadd.f32 %v268_v35, %v267_v29 }
  0xbb   :  { %v241_v37 = vadd.f32 %v240_v36, %v239_v33 }
  0xbd   :  { %316 = vpush %v241_v37 }
  0xbe   :  { %318 = vpush %v269_v38 }
  0xe3   :  { %s309_s14 = spop %308 }
  0xe7   :  { %s311_s15 = spop %310 }
  0xe8   :  { %s177_s16 = sadd.f32 %s311_s15, %s309_s14  ;;  %s313_s17 = spop %312 }
  0xe9   :  { %s315_s6 = spop %314 }
  0xea   :  { %s178_s10 = smul.f32 %s306_s1, %s177_s16  ;;  %s208_s19 = sadd.f32 %s315_s6, %s313_s17 }
  0xec   :  { %s209_s20 = smul.f32 %s307_s3, %s208_s19 }
  0xee   :  { %s317_s21 = spop %316  ;;  %s210_s4 = sadd.f32 %s209_s20, %s178_s10 }
  0xef   :  { %s319_s22 = spop %318 }
  0xf0   :  { %s271_s23 = sadd.f32 %s319_s22, %s317_s21  ;;  %v212_v39 = vstv %s210_s4 }
  0xf2   :  { %s273_s24 = smul.f32 %s271_s23, %s131_s18 }
  0xf4   :  { %v274_v40 = vstv %s273_s24 }
  0xf5   :  { %v275_v41 = vadd.f32 %v274_v40, %v212_v39 }
  0xf7   :  { %276 = vst [vmem:[%s486_s11] sm:$0xff] %v275_v41 }
  0xf8   :  { %281 = vsyncpa [#allocation3], 1 }

</bundles_post_ra>
